<compile_context>
chip_gen: v5e
topology: v5e:2x2
jax: 0.10.0
libtpu: 0.0.40
codegen_flags: <defaults>
</compile_context>

<pallas_src>
import math

import jax
import jax.numpy as jnp
from jax.experimental import pallas as pl
from jax.experimental.pallas import tpu as pltpu

LN_EPS = 1e-5  # torch.nn.LayerNorm default


def _round_up(x, m):
    return ((x + m - 1) // m) * m


def _choose_row_tile(h_out, w_out_p, batch, max_tokens=4096):
    """Largest divisor of h_out whose tile stays under `max_tokens` tokens.

    Also keeps batch * num_tiles >= 2 when possible so both v7x TensorCores
    get work under dimension_semantics=("parallel", "parallel")."""
    tr = 1
    for d in range(1, h_out + 1):
        if h_out % d == 0 and d * w_out_p <= max_tokens:
            tr = d
    if batch == 1 and tr == h_out and h_out % 2 == 0:
        tr = h_out // 2
    return tr


def _fold_input(x, kernel_size, stride, pad, h_out_pad, w_out_p, n_q, dtype):
    """(B, C, H, W) -> (B, Rq, W_out_p, stride*K*C) in `dtype`, where

        out[b, rq, ow, r*K*C + kw*C + c]
            = x_padded[b, rq*stride + r, ow*stride + kw, c]

    Only the W-direction im2col (factor K/stride) is materialized in HBM; the
    row-direction overlap is handled inside the kernel."""
    B, C, H, W = x.shape
    K = kernel_size
    rq = h_out_pad + (n_q - 1)
    rows_need = rq * stride
    cols_need = (w_out_p - 1) * stride + K

    x = jnp.transpose(x.astype(dtype), (0, 2, 3, 1))        # NHWC, low precision
    x = jnp.pad(x, ((0, 0),
                    (pad, max(rows_need - H - pad, 0)),
                    (pad, max(cols_need - W - pad, 0)),
                    (0, 0)))
    x = x[:, :rows_need, :cols_need, :]

    # W-direction window expansion: (B, rows, W_out_p, K, C)
    slabs = [x[:, :, kw:kw + (w_out_p - 1) * stride + 1:stride, :]
             for kw in range(K)]
    xw = jnp.stack(slabs, axis=3)
    xw = xw.reshape(B, rq, stride, w_out_p, K * C)
    xw = jnp.transpose(xw, (0, 1, 3, 2, 4))                 # (B, Rq, W_out_p, stride, K*C)
    return xw.reshape(B, rq, w_out_p, stride * K * C)


def _fold_weight(conv_w, stride, n_q, dtype):
    """(E, C, K, K) -> (n_q, stride*K*C, E); rows with kh >= K are zero."""
    E, C, K, _ = conv_w.shape
    w = jnp.transpose(conv_w, (2, 3, 1, 0)).reshape(K, K * C, E)   # [kh, kw*C+c, e]
    w = jnp.pad(w, ((0, n_q * stride - K), (0, 0), (0, 0)))
    return w.reshape(n_q, stride * K * C, E).astype(dtype)


def overlap_patch_embed(x, conv_w, conv_b, ln_gamma, ln_beta, *, stride,
                        row_tile=None, matmul_dtype=jnp.bfloat16):
    """x: (B,C,H,W); conv_w: (E,C,K,K); conv_b/ln_gamma/ln_beta: (E,).
    Returns (out of shape (B, H_out*W_out, E), H_out, W_out)."""
    E, C, K, _ = conv_w.shape
    pad = K // 2
    B, _, H, W = x.shape

    h_out = (H + 2 * pad - K) // stride + 1
    w_out = (W + 2 * pad - K) // stride + 1
    w_out_p = _round_up(w_out, 8)          # keeps in-kernel reshapes tile-aligned
    n_q = -(-K // stride)                  # ceil(K / stride): row-group offsets

    if row_tile is None:
        row_tile = _choose_row_tile(h_out, w_out_p, B)
    assert h_out % row_tile == 0, (h_out, row_tile)
    n_row_tiles = h_out // row_tile
    trw = row_tile * w_out_p               # tokens written per grid step
    rq = h_out + (n_q - 1)                 # row groups resident in VMEM
    skc = stride * K * C                   # contraction width per row group

    x_fold = _fold_input(x, K, stride, pad, h_out, w_out_p, n_q, matmul_dtype)
    w_q = _fold_weight(conv_w, stride, n_q, matmul_dtype)
    b2 = conv_b.reshape(1, E).astype(jnp.float32)
    g2 = ln_gamma.reshape(1, E).astype(jnp.float32)
    be2 = ln_beta.reshape(1, E).astype(jnp.float32)

    def kernel(x_ref, w_ref, b_ref, g_ref, beta_ref, o_ref):
        # x_ref:    (Rq, W_out_p, SKC) bf16 -- whole image, resident across tiles
        # w_ref:    (n_q, SKC, E)      bf16
        # b/g/beta: (1, E)             f32
        # o_ref:    (TRW, E)
        oh0 = pl.program_id(1) * row_tile
        acc = jnp.zeros((trw, E), jnp.float32)
        for q in range(n_q):   # ceil(K/stride) MXU matmuls, contraction = SKC
            xq = x_ref[pl.ds(oh0 + q, row_tile), :, :].reshape(trw, skc)
            acc = acc + jnp.dot(xq, w_ref[q],
                                preferred_element_type=jnp.float32)
        y = acc + b_ref[...]
        # LayerNorm over embed dim (biased variance), all in f32.
        mean = jnp.mean(y, axis=-1, keepdims=True)
        cent = y - mean
        var = jnp.mean(cent * cent, axis=-1, keepdims=True)
        y = cent * jax.lax.rsqrt(var + LN_EPS)
        o_ref[...] = (y * g_ref[...] + beta_ref[...]).astype(o_ref.dtype)

    # Only raise the scoped-VMEM limit when the resident image block needs it.
    vmem_est = (2 * rq * w_out_p * _round_up(skc, 128) * 2      # x_fold, 2 bufs
                + 6 * trw * max(E, 128) * 4)                    # out bufs + acc
    vmem_limit = None if vmem_est < (12 << 20) else min(2 * vmem_est, 96 << 20)

    out = pl.pallas_call(
        kernel,
        out_shape=jax.ShapeDtypeStruct((B, h_out * w_out_p, E), x.dtype),
        grid_spec=pltpu.PrefetchScalarGridSpec(
            num_scalar_prefetch=0,
            grid=(B, n_row_tiles),
            in_specs=[
                pl.BlockSpec((pl.Squeezed(), rq, w_out_p, skc),
                             lambda b, t: (b, 0, 0, 0)),
                pl.BlockSpec((n_q, skc, E), lambda b, t: (0, 0, 0)),
                pl.BlockSpec((1, E), lambda b, t: (0, 0)),
                pl.BlockSpec((1, E), lambda b, t: (0, 0)),
                pl.BlockSpec((1, E), lambda b, t: (0, 0)),
            ],
            out_specs=pl.BlockSpec((pl.Squeezed(), trw, E),
                                   lambda b, t: (b, t, 0)),
        ),
        compiler_params=pltpu.CompilerParams(
            dimension_semantics=("parallel", "parallel"),
            vmem_limit_bytes=vmem_limit),
    )(x_fold, w_q, b2, g2, be2)

    out = out.reshape(B, h_out, w_out_p, E)
    if w_out_p != w_out:
        out = out[:, :, :w_out, :]   # slack columns exist only when W_out % 8 != 0
    return out.reshape(B, h_out * w_out, E), h_out, w_out


def init_params(key, in_chans, embed_dim, patch_size):
    # Conv2d init per module._init_weights: normal(0, sqrt(2/fan_out)), bias=0
    fan_out = patch_size * patch_size * embed_dim  # groups=1
    std = math.sqrt(2.0 / fan_out)
    conv_w = std * jax.random.normal(
        key, (embed_dim, in_chans, patch_size, patch_size), dtype=jnp.float32)
    conv_b = jnp.zeros((embed_dim,), jnp.float32)
    # LayerNorm init: weight=1, bias=0
    ln_gamma = jnp.ones((embed_dim,), jnp.float32)
    ln_beta = jnp.zeros((embed_dim,), jnp.float32)
    return conv_w, conv_b, ln_gamma, ln_beta


def _reference(x, conv_w, conv_b, ln_gamma, ln_beta, stride):
    """Plain-JAX f32 reference matching the PyTorch module forward."""
    K = conv_w.shape[-1]
    pad = K // 2
    y = jax.lax.conv_general_dilated(
        x, conv_w, window_strides=(stride, stride),
        padding=((pad, pad), (pad, pad)),
        dimension_numbers=("NCHW", "OIHW", "NCHW"))
    B, E, Ho, Wo = y.shape
    y = jnp.transpose(y.reshape(B, E, Ho * Wo), (0, 2, 1)) + conv_b[None, None, :]
    mean = y.mean(-1, keepdims=True)
    var = ((y - mean) ** 2).mean(-1, keepdims=True)
    y = (y - mean) * jax.lax.rsqrt(var + LN_EPS)
    return y * ln_gamma[None, None, :] + ln_beta[None, None, :], Ho, Wo


if __name__ == "__main__":
    key = jax.random.PRNGKey(0)
    k_x, k_w, k_b, k_g, k_be, k_x2 = jax.random.split(key, 6)

    patch_size, stride, embed_dim, C = 7, 4, 32, 3
    conv_w, conv_b, ln_gamma, ln_beta = init_params(k_w, C, embed_dim, patch_size)
    # Non-trivial bias / affine params so the correctness check exercises them.
    conv_b = 0.1 * jax.random.normal(k_b, (embed_dim,), jnp.float32)
    ln_gamma = 1.0 + 0.1 * jax.random.normal(k_g, (embed_dim,), jnp.float32)
    ln_beta = 0.1 * jax.random.normal(k_be, (embed_dim,), jnp.float32)

    # Case 1: B=2, 16x16 -> H_out=W_out=4 (W_out padded to 8 in-kernel, one
    #         row tile, grid (2, 1)).
    # Case 2: B=1, 32x32 -> H_out=W_out=8 (no W padding, two row tiles, so the
    #         multi-tile / oh0 > 0 path is exercised).
    cases = [
        ((2, C, 16, 16), k_x),
        ((1, C, 32, 32), k_x2),
    ]
    for shape, kk in cases:
        x = jax.random.normal(kk, shape, dtype=jnp.float32)
        out, H_out, W_out = overlap_patch_embed(
            x, conv_w, conv_b, ln_gamma, ln_beta, stride=stride)
        out = jax.block_until_ready(out)

        ref, Ho_ref, Wo_ref = _reference(x, conv_w, conv_b, ln_gamma, ln_beta,
                                         stride)
        assert (Ho_ref, Wo_ref) == (H_out, W_out), (Ho_ref, Wo_ref, H_out, W_out)
        assert out.shape == (shape[0], H_out * W_out, embed_dim), out.shape

        # Numerics vs f32 reference (kernel uses bf16 operands, f32 accumulation).
        max_err = float(jnp.max(jnp.abs(out.astype(jnp.float32) - ref)))
        assert max_err < 5e-2, f"shape={shape} max abs err {max_err}"

    print("KERNEL_OK")
</pallas_src>

<mosaic_0001>
module attributes {stable_mosaic.version = 11 : i64} {
  func.func @kernel(%arg0: i32, %arg1: i32, %arg2: memref<1x5x8x84xbf16, #tpu.memory_space<vmem>>, %arg3: memref<2x84x32xbf16, #tpu.memory_space<vmem>>, %arg4: memref<1x32xf32, #tpu.memory_space<vmem>>, %arg5: memref<1x32xf32, #tpu.memory_space<vmem>>, %arg6: memref<1x32xf32, #tpu.memory_space<vmem>>, %arg7: memref<1x32x32xf32, #tpu.memory_space<vmem>>) attributes {dimension_semantics = [#tpu.dimension_semantics<parallel>, #tpu.dimension_semantics<parallel>], iteration_bounds = array<i64: 2, 1>, scalar_prefetch = 0 : i64, scratch_operands = 0 : i64, tpu.core_type = #tpu.core_type<tc>, window_params = [{transform_indices = @transform_0, window_bounds = array<i64: 1, 5, 8, 84>}, {pipeline_mode = #tpu.pipeline_mode<synchronous>, transform_indices = @transform_1, window_bounds = array<i64: 2, 84, 32>}, {pipeline_mode = #tpu.pipeline_mode<synchronous>, transform_indices = @transform_2, window_bounds = array<i64: 1, 32>}, {pipeline_mode = #tpu.pipeline_mode<synchronous>, transform_indices = @transform_3, window_bounds = array<i64: 1, 32>}, {pipeline_mode = #tpu.pipeline_mode<synchronous>, transform_indices = @transform_4, window_bounds = array<i64: 1, 32>}, {transform_indices = @transform_5, window_bounds = array<i64: 1, 32, 32>}]} {
    %c4_i32 = arith.constant 4 : i32
    %0 = arith.muli %arg1, %c4_i32 : i32
    %cst = arith.constant 0.000000e+00 : f32
    %1 = vector.broadcast %cst : f32 to vector<32x32xf32>
    %c0_i32 = arith.constant 0 : i32
    %2 = arith.addi %0, %c0_i32 : i32
    %c0 = arith.constant 0 : index
    %3 = arith.index_cast %2 : i32 to index
    %c0_0 = arith.constant 0 : index
    %c0_1 = arith.constant 0 : index
    %4 = vector.load %arg2[%c0, %3, %c0_0, %c0_1] : memref<1x5x8x84xbf16, #tpu.memory_space<vmem>>, vector<1x4x8x84xbf16>
    %5 = vector.shape_cast %4 : vector<1x4x8x84xbf16> to vector<4x8x84xbf16>
    %6 = vector.shape_cast %5 : vector<4x8x84xbf16> to vector<32x84xbf16>
    %c0_2 = arith.constant 0 : index
    %c0_3 = arith.constant 0 : index
    %c0_4 = arith.constant 0 : index
    %7 = vector.load %arg3[%c0_2, %c0_3, %c0_4] : memref<2x84x32xbf16, #tpu.memory_space<vmem>>, vector<1x84x32xbf16>
    %8 = vector.shape_cast %7 : vector<1x84x32xbf16> to vector<84x32xbf16>
    %cst_5 = arith.constant dense<0.000000e+00> : vector<32x32xf32>
    %9 = tpu.matmul %6, %8, %cst_5 {dimension_numbers = #tpu.dot_dimension_numbers<[1], [0], [0], [1], [0, 0, 1, 1], [], []>} : vector<32x84xbf16>, vector<84x32xbf16>, vector<32x32xf32> -> vector<32x32xf32>
    %10 = arith.addf %1, %9 : vector<32x32xf32>
    %c1_i32 = arith.constant 1 : i32
    %11 = arith.addi %0, %c1_i32 : i32
    %c0_6 = arith.constant 0 : index
    %12 = arith.index_cast %11 : i32 to index
    %c0_7 = arith.constant 0 : index
    %c0_8 = arith.constant 0 : index
    %13 = vector.load %arg2[%c0_6, %12, %c0_7, %c0_8] : memref<1x5x8x84xbf16, #tpu.memory_space<vmem>>, vector<1x4x8x84xbf16>
    %14 = vector.shape_cast %13 : vector<1x4x8x84xbf16> to vector<4x8x84xbf16>
    %15 = vector.shape_cast %14 : vector<4x8x84xbf16> to vector<32x84xbf16>
    %c1 = arith.constant 1 : index
    %c0_9 = arith.constant 0 : index
    %c0_10 = arith.constant 0 : index
    %16 = vector.load %arg3[%c1, %c0_9, %c0_10] : memref<2x84x32xbf16, #tpu.memory_space<vmem>>, vector<1x84x32xbf16>
    %17 = vector.shape_cast %16 : vector<1x84x32xbf16> to vector<84x32xbf16>
    %cst_11 = arith.constant dense<0.000000e+00> : vector<32x32xf32>
    %18 = tpu.matmul %15, %17, %cst_11 {dimension_numbers = #tpu.dot_dimension_numbers<[1], [0], [0], [1], [0, 0, 1, 1], [], []>} : vector<32x84xbf16>, vector<84x32xbf16>, vector<32x32xf32> -> vector<32x32xf32>
    %19 = arith.addf %10, %18 : vector<32x32xf32>
    %c0_12 = arith.constant 0 : index
    %c0_13 = arith.constant 0 : index
    %20 = vector.load %arg4[%c0_12, %c0_13] : memref<1x32xf32, #tpu.memory_space<vmem>>, vector<1x32xf32>
    %21 = vector.broadcast %20 : vector<1x32xf32> to vector<32x32xf32>
    %22 = arith.addf %19, %21 : vector<32x32xf32>
    %cst_14 = arith.constant dense<0.000000e+00> : vector<32xf32>
    %23 = vector.multi_reduction <add>, %22, %cst_14 [1] : vector<32x32xf32> to vector<32xf32>
    %24 = vector.shape_cast %23 : vector<32xf32> to vector<32x1xf32>
    %cst_15 = arith.constant 3.200000e+01 : f32
    %25 = vector.broadcast %cst_15 : f32 to vector<32x1xf32>
    %26 = arith.divf %24, %25 : vector<32x1xf32>
    %27 = vector.broadcast %26 : vector<32x1xf32> to vector<32x32xf32>
    %28 = arith.subf %22, %27 : vector<32x32xf32>
    %29 = arith.mulf %28, %28 : vector<32x32xf32>
    %cst_16 = arith.constant dense<0.000000e+00> : vector<32xf32>
    %30 = vector.multi_reduction <add>, %29, %cst_16 [1] : vector<32x32xf32> to vector<32xf32>
    %31 = vector.shape_cast %30 : vector<32xf32> to vector<32x1xf32>
    %cst_17 = arith.constant 3.200000e+01 : f32
    %32 = vector.broadcast %cst_17 : f32 to vector<32x1xf32>
    %33 = arith.divf %31, %32 : vector<32x1xf32>
    %cst_18 = arith.constant 9.99999974E-6 : f32
    %34 = vector.broadcast %cst_18 : f32 to vector<32x1xf32>
    %35 = arith.addf %33, %34 : vector<32x1xf32>
    %36 = math.rsqrt %35 : vector<32x1xf32>
    %37 = vector.broadcast %36 : vector<32x1xf32> to vector<32x32xf32>
    %38 = arith.mulf %28, %37 : vector<32x32xf32>
    %c0_19 = arith.constant 0 : index
    %c0_20 = arith.constant 0 : index
    %39 = vector.load %arg5[%c0_19, %c0_20] : memref<1x32xf32, #tpu.memory_space<vmem>>, vector<1x32xf32>
    %40 = vector.broadcast %39 : vector<1x32xf32> to vector<32x32xf32>
    %41 = arith.mulf %38, %40 : vector<32x32xf32>
    %c0_21 = arith.constant 0 : index
    %c0_22 = arith.constant 0 : index
    %42 = vector.load %arg6[%c0_21, %c0_22] : memref<1x32xf32, #tpu.memory_space<vmem>>, vector<1x32xf32>
    %43 = vector.broadcast %42 : vector<1x32xf32> to vector<32x32xf32>
    %44 = arith.addf %41, %43 : vector<32x32xf32>
    %c0_23 = arith.constant 0 : index
    %c0_24 = arith.constant 0 : index
    %c0_25 = arith.constant 0 : index
    %45 = vector.load %arg7[%c0_23, %c0_24, %c0_25] : memref<1x32x32xf32, #tpu.memory_space<vmem>>, vector<1x32x32xf32>
    %46 = vector.shape_cast %45 : vector<1x32x32xf32> to vector<32x32xf32>
    %47 = vector.shape_cast %44 : vector<32x32xf32> to vector<1x32x32xf32>
    tpu.vector_store %arg7[%c0_23, %c0_24, %c0_25], %47 {strides = array<i32>} : memref<1x32x32xf32, #tpu.memory_space<vmem>>, vector<1x32x32xf32>,
    return
  }
  func.func @transform_0(%arg0: i32, %arg1: i32) -> (i32, i32, i32, i32) {
    %c0_i32 = arith.constant 0 : i32
    %c0_i32_0 = arith.constant 0 : i32
    %c0_i32_1 = arith.constant 0 : i32
    %c0_i32_2 = arith.constant 0 : i32
    return %arg0, %c0_i32, %c0_i32_0, %c0_i32_1 : i32, i32, i32, i32
  }
  func.func @transform_1(%arg0: i32, %arg1: i32) -> (i32, i32, i32) {
    %c0_i32 = arith.constant 0 : i32
    %c0_i32_0 = arith.constant 0 : i32
    %c0_i32_1 = arith.constant 0 : i32
    %c0_i32_2 = arith.constant 0 : i32
    return %c0_i32, %c0_i32_0, %c0_i32_1 : i32, i32, i32
  }
  func.func @transform_2(%arg0: i32, %arg1: i32) -> (i32, i32) {
    %c0_i32 = arith.constant 0 : i32
    %c0_i32_0 = arith.constant 0 : i32
    %c0_i32_1 = arith.constant 0 : i32
    return %c0_i32, %c0_i32_0 : i32, i32
  }
  func.func @transform_3(%arg0: i32, %arg1: i32) -> (i32, i32) {
    %c0_i32 = arith.constant 0 : i32
    %c0_i32_0 = arith.constant 0 : i32
    %c0_i32_1 = arith.constant 0 : i32
    return %c0_i32, %c0_i32_0 : i32, i32
  }
  func.func @transform_4(%arg0: i32, %arg1: i32) -> (i32, i32) {
    %c0_i32 = arith.constant 0 : i32
    %c0_i32_0 = arith.constant 0 : i32
    %c0_i32_1 = arith.constant 0 : i32
    return %c0_i32, %c0_i32_0 : i32, i32
  }
  func.func @transform_5(%arg0: i32, %arg1: i32) -> (i32, i32, i32) {
    %c0_i32 = arith.constant 0 : i32
    %c0_i32_0 = arith.constant 0 : i32
    return %arg0, %arg1, %c0_i32 : i32, i32, i32
  }
}

</mosaic_0001>

<bundles_post_ra>
// kernel: tpu_custom_call.1
= control target key start
LH: loop header
LB: loop body
LE: loop exit
PB: predicated region body
PF: predicated region fallthrough
CT: control target
= control target key end

     0   :  { %10 = vsyncpa [#allocation3], 0  ;;  %s1113_s0 = inlined_call_operand.vmem [shape: bf16[2,5,8,84], index: 0, kind: input, shape index: {}]   ;;  %s1114_s1 = inlined_call_operand.vmem [shape: bf16[2,84,32], index: 1, kind: input, shape index: {}]   ;;  %s1115_s2 = inlined_call_operand.vmem [shape: f32[1,32], index: 2, kind: input, shape index: {}]   ;;  %s1116_s3 = inlined_call_operand.vmem [shape: f32[1,32], index: 3, kind: input, shape index: {}]   ;;  %s1117_s4 = inlined_call_operand.vmem [shape: f32[1,32], index: 4, kind: input, shape index: {}]   ;;  %s1118_s5 = inlined_call_operand.hbm [shape: f32[2,32,32], index: 5, kind: output, shape index: {}]  }
   0x1   :  { %12 = vsyncpa [#allocation3 + $0x1], 0  ;;  %s940_s18 = smov 0   ;;  %s942_s19 = smov 0  }
   0x2   :  { %s944_s20 = smov 0   ;;  %s946_s21 = smov 0  }
   0x3   :  { %s948_s22 = smov 0   ;;  %s950_s23 = smov 0  }
   0x4 LB: > { %s641_s24 = sadd.s32 4294967295, %s905_s23   ;;  %s642_s25 = sadd.s32 4294967294, %s905_s23   ;;  %s905_s23 = sphi %s950_s23, %s18_s23   ;;  %s901_s22 = sphi %s948_s22, %s1125_s22   ;;  %s897_s21 = sphi %s946_s21, %s1124_s21   ;;  %s893_s20 = sphi %s944_s20, %s1123_s20   ;;  %s889_s19 = sphi %s942_s19, %s1122_s19   ;;  %s885_s18 = sphi %s940_s18, %s1121_s18  }
   0x5   : > { %s30_s26 = sadd.s32 1, %s901_s22  ;;  %s149_s27 = sadd.s32 1, %s893_s20 }
   0x6   : > { %p32_p0 = scmp.ge.s32.totalorder %s30_s26, 2  ;;  %p159_p1 = scmp.ne.s32.totalorder %s893_s20, %s889_s19 }
   0x7   : > { %p160_p2 = scmp.eq.s32.totalorder %s641_s24, 1  ;;  %p165_p3 = scmp.ne.s32.totalorder %s889_s19, %s885_s18 }
   0x8   : > { %s1127_s26 = smov (%p32_p0, %s30_s26), 0  ;;  %p166_p5 = scmp.eq.s32.totalorder %s642_s25, 1 }
   0x9   : > { %p980_p4 = por %p160_p2, %p159_p1  ;;  %s144_s29 = ssub.s32 %s901_s22, %s1127_s26 }
   0xa   : > { %p645_p6 = scmp.ge.s32.totalorder %s905_s23, 1  ;;  %p147_p7 = scmp.eq.s32.totalorder %s144_s29, 0 }
   0xb   : > { %p987_p8 = por %p166_p5, %p165_p3  ;;  %p204_p9 = scmp.lt.s32.totalorder %s905_s23, 3 }
   0xc   : > { %s993_s6 = scalar_select %p147_p7, %s893_s20, %s149_s27  }
   0xd   : > { %p205_p10 = pnand %p645_p6, %p204_p9 }
   0xe   : > { %p232_p11 = scmp.lt.s32.totalorder (!%p205_p10), %s897_s21, 1  ;;  %s229_s8 = sand.u32 (!%p205_p10), 1, %s889_s19  }
   0xf   : > { %208 = sbr.rel (%p205_p10) target bundleno = 466 (0x1d2), region = 40  ;;  %s646_s13 = sshll.u32 (!%p205_p10), %s229_s8, 5 }
  0x10   : > { %s231_s14 = scalar_lea.vmem (!%p205_p10), [#allocation2], %s646_s13  ;;  %s742_s15 = sshll.u32 (!%p205_p10), %s897_s21, 5 }
  0x11   : > { %s545_s27 = scalar_lea.sflag (!%p205_p10), [#allocation3], %s229_s8 }
  0x14   : > { %v662_v0 = vld [vmem:[%s1114_s1 + $0x54] sm:$0x3]  ;;  %v256_v1 = vld [vmem:[%s1114_s1 + $0x28] sm:$0x3]  ;;  %vm326_vm0 = vcmask 1041408   ;;  %v741_v8 = vld [vmem:[%s1114_s1 + $0x4c] sm:$0xff] }
  0x15   : > { %v307_v2 = vunpack.c.l.b16 %v662_v0  ;;  %v380_v3 = vunpack.c.l.b16 %v256_v1  ;;  %v734_v9 = vld [vmem:[%s1114_s1 + $0x20] sm:$0xff]  ;;  %v733_v11 = vld [vmem:[%s1114_s1 + $0x18] sm:$0xff]  ;;  %s233_s29 = scalar_select %p232_p11, %s897_s21, 1  ;;  %v732_v13 = vld [vmem:[%s1114_s1 + $0x10] sm:$0xff]  ;;  %vm319_vm1 = vcmask 687104   ;;  %vm428_vm2 = vcmask 261120  }
  0x16   : > { %v740_v10 = vld [vmem:[%s1114_s1 + $0x44] sm:$0xff]  ;;  %v739_v12 = vld [vmem:[%s1114_s1 + $0x3c] sm:$0xff]  ;;  %v738_v14 = vld [vmem:[%s1114_s1 + $0x34] sm:$0xff]  ;;  %v907_v43 = vmov 32.0   ;;  %s559_s21 = sshll.u32 %s231_s14, 4  ;;  %s560_s21 = int_to_ptr.vmem [resolvable:$true] %s559_s21 }
  0x17   : > { %v313_v4 = vpack.c.b16 %v307_v2, %v307_v2  ;;  %v386_v5 = vpack.c.b16 %v380_v3, %v380_v3  ;;  %s755_s11 = smul.u32 20, %s233_s29  ;;  %v731_v15 = vld [vmem:[%s1114_s1 + $0x8] sm:$0xff]  ;;  %v730_v17 = vld [vmem:[%s1114_s1] sm:$0xff]  ;;  %817 = vrcp.f32 %v907_v43 }
  0x18   : > { %v737_v16 = vld [vmem:[%s1114_s1 + $0x2c] sm:$0xff]  ;;  %v814_v23 = vld [vmem:[%s1115_s2] ss:$0 sm:$0xff] }
  0x19   : > { %v328_v6 = vsel %vm326_vm0, %v313_v4, 0  ;;  %v399_v7 = vsel %vm326_vm0, %v386_v5, 0  ;;  %s236_s24 = scalar_lea.vmem %s1113_s0, %s755_s11  ;;  %s847_s11 = scalar_lea.hbm %s1118_s5, 64 }
  0x1a   : > { %332 = vmatpush.bf16.msra.mxu0 %v328_v6  ;;  %743 = vmatpush.bf16.msra.mxu2 %v328_v6  ;;  %v735_v18 = vld [vmem:[%s236_s24 + $0x4] sm:$0xff]  ;;  %v736_v19 = vld [vmem:[%s236_s24 + $0xc] sm:$0xff] }
  0x1b   : > { %403 = vmatpush.bf16.msra.mxu1 %v399_v7  ;;  %749 = vmatpush.bf16.msra.mxu3 %v399_v7  ;;  %v728_v20 = vld [vmem:[%s236_s24] sm:$0xff]  ;;  %v729_v21 = vld [vmem:[%s236_s24 + $0x8] sm:$0xff]  ;;  %s558_s24 = scalar_lea.hbm %s1118_s5, %s742_s15 }
  0x1c   : > { %s561_s25 = sshll.u32 %s558_s24, 4  ;;  %s562_s25 = int_to_ptr.hbm [resolvable:$true] %s561_s25 }
  0x1d   : > { %v818_v44 = vpop.eup %817  ;;  %s841_s29 = sshra.s32 %s562_s25, 4  ;;  %s842_s29 = int_to_ptr.hbm [resolvable:$true] %s841_s29 }
  0x1e   : > { %333 = vmatpush.bf16.msra.mxu0 %v741_v8  ;;  %744 = vmatpush.bf16.msra.mxu2 %v741_v8  ;;  %v442_v45 = vmul.f32 32.0, %v818_v44  ;;  %vm446_vm3 = vweird.f32 %v818_v44  ;;  %s843_s7 = scalar_lea.hbm %s842_s29, 32  ;;  %p848_p1 = scmp.lt.s32.totalorder %s842_s29, %s1118_s5 }
  0x1f   : > { %404 = vmatpush.bf16.msra.mxu1 %v734_v9  ;;  %750 = vmatpush.bf16.msra.mxu3 %v734_v9  ;;  %p844_p12 = scmp.ne.s32.totalorder %s842_s29, %s843_s7  ;;  %p849_p2 = scmp.lt.s32.totalorder %s847_s11, %s843_s7 }
  0x20   : > { %v443_v46 = vsub.f32 1.0, %v442_v45 }
  0x21   : > { %p845_p13 = pnand %p844_p12, %p980_p4  ;;  %p850_p3 = por %p849_p2, %p848_p1 }
  0x22   : > { %334 = vmatpush.bf16.msra.mxu0 %v740_v10  ;;  %745 = vmatpush.bf16.msra.mxu2 %v740_v10  ;;  %v444_v47 = vmul.f32 %v818_v44, %v443_v46 }
  0x23   : > { %405 = vmatpush.bf16.msra.mxu1 %v733_v11  ;;  %751 = vmatpush.bf16.msra.mxu3 %v733_v11  ;;  %p846_p0 = pneg %p845_p13 }
  0x24   : > { %v445_v48 = vadd.f32 %v818_v44, %v444_v47 }
  0x25   : > { %p851_p5 = pnand %p850_p3, %p846_p0 }
  0x26   : > { %335 = vmatpush.bf16.msra.mxu0 %v739_v12  ;;  %746 = vmatpush.bf16.msra.mxu2 %v739_v12  ;;  %v447_v49 = vsel %vm446_vm3, %v818_v44, %v445_v48 }
  0x27   : > { %406 = vmatpush.bf16.msra.mxu1 %v732_v13  ;;  %752 = vmatpush.bf16.msra.mxu3 %v732_v13 }
  0x2a   : > { %336 = vmatpush.bf16.msra.mxu0 %v738_v14  ;;  %747 = vmatpush.bf16.msra.mxu2 %v738_v14 }
  0x2b   : > { %407 = vmatpush.bf16.msra.mxu1 %v731_v15  ;;  %753 = vmatpush.bf16.msra.mxu3 %v731_v15 }
  0x2e   : > { %337 = vmatpush.bf16.msra.mxu0 %v737_v16  ;;  %748 = vmatpush.bf16.msra.mxu2 %v737_v16 }
  0x2f   : > { %408 = vmatpush.bf16.msra.mxu1 %v730_v17  ;;  %754 = vmatpush.bf16.msra.mxu3 %v730_v17 }
  0x31   : > { %691 = vmatmul.msk.bf16.vlgmr.msra.gmra.mxu0 %vm319_vm1, %v735_v18  ;;  %692 = vmatmul.msk.bf16.vlgmr.msra.gmra.mxu2 %vm319_vm1, %v736_v19 }
  0x32   : > { %721 = vmatmul.msk.bf16.vlgmr.msra.gmra.mxu1 %vm319_vm1, %v728_v20  ;;  %722 = vmatmul.msk.bf16.vlgmr.msra.gmra.mxu3 %vm319_vm1, %v729_v21 }
  0xae   : > { %v339_v22 = vpop.f32.mrf.mxu0 }
  0xaf   : > { %v410_v24 = vpop.f32.mrf.mxu1 }
  0xb0   : > { %v411_v25 = vadd.f32 %v410_v24, %v339_v22 }
  0xb2   : > { %v424_v26 = vadd.f32 %v814_v23, %v411_v25 }
  0xb4   : > { %v344_v27 = vpop.f32.mrf.mxu2  ;;  %v429_v28 = vsel %vm428_vm2, %v424_v26, 0.0 }
  0xb5   : > { %v415_v29 = vpop.f32.mrf.mxu3  ;;  %430 = vadd.xlane.f32.xlu0 %v429_v28 }
  0xb6   : > { %v416_v30 = vadd.f32 %v415_v29, %v344_v27  ;;  %v341_v31 = vpop.f32.mrf.mxu0  ;;  %v815_v29 = vld [vmem:[%s1116_s3] ss:$0 sm:$0xff] }
  0xb7   : > { %v412_v32 = vpop.f32.mrf.mxu1 }
  0xb8   : > { %v413_v33 = vadd.f32 %v412_v32, %v341_v31  ;;  %v426_v34 = vadd.f32 %v814_v23, %v416_v30 }
  0xba   : > { %v435_v35 = vsel %vm428_vm2, %v426_v34, 0.0  ;;  %v425_v36 = vadd.f32 %v814_v23, %v413_v33  ;;  %v816_v33 = vld [vmem:[%s1117_s4] ss:$0 sm:$0xff] }
  0xbb   : > { %436 = vadd.xlane.f32.xlu1 %v435_v35 }
  0xbc   : > { %v346_v37 = vpop.f32.mrf.mxu2  ;;  %v432_v38 = vsel %vm428_vm2, %v425_v36, 0.0 }
  0xbd   : > { %v417_v39 = vpop.f32.mrf.mxu3  ;;  %433 = vadd.xlane.f32.xlu0 %v432_v38 }
  0xbe   : > { %v418_v40 = vadd.f32 %v417_v39, %v346_v37 }
  0xc0   : > { %v427_v41 = vadd.f32 %v814_v23, %v418_v40 }
  0xc2   : > { %v438_v42 = vsel %vm428_vm2, %v427_v41, 0.0 }
  0xc3   : > { %439 = vadd.xlane.f32.xlu1 %v438_v42 }
 0x128   : > { %v431_v50 = vpop.xlane.xlu0 %430 }
 0x129   : > { %v448_v51 = vmul.f32 %v447_v49, %v431_v50 }
 0x12b   : > { %v452_v52 = vsub.f32 %v424_v26, %v448_v51 }
 0x12d   : > { %v456_v53 = vmul.f32 %v452_v52, %v452_v52 }
 0x12e   : > { %v437_v54 = vpop.xlane.xlu1 %436 }
 0x12f   : > { %v450_v55 = vmul.f32 %v447_v49, %v437_v54  ;;  %v460_v56 = vsel %vm428_vm2, %v456_v53, 0.0 }
 0x130   : > { %461 = vadd.xlane.f32.xlu2 %v460_v56  ;;  %v434_v57 = vpop.xlane.xlu0 %433 }
 0x131   : > { %v1044_v58 = vsub.f32 %v426_v34, %v450_v55  ;;  %v449_v59 = vmul.f32 %v447_v49, %v434_v57 }
 0x133   : > { %v1046_v60 = vsub.f32 %v425_v36, %v449_v59  ;;  %v458_v61 = vmul.f32 %v1044_v58, %v1044_v58 }
 0x135   : > { %v466_v62 = vsel %vm428_vm2, %v458_v61, 0.0  ;;  %v457_v63 = vmul.f32 %v1046_v60, %v1046_v60 }
 0x136   : > { %v440_v0 = vpop.xlane.xlu1 %439  ;;  %467 = vadd.xlane.f32.xlu0 %v466_v62 }
 0x137   : > { %v451_v1 = vmul.f32 %v447_v49, %v440_v0  ;;  %v463_v2 = vsel %vm428_vm2, %v457_v63, 0.0 }
 0x138   : > { %464 = vadd.xlane.f32.xlu2 %v463_v2 }
 0x139   : > { %v1054_v3 = vsub.f32 %v427_v41, %v451_v1 }
 0x13b   : > { %v459_v4 = vmul.f32 %v1054_v3, %v1054_v3 }
 0x13d   : > { %v469_v5 = vsel %vm428_vm2, %v459_v4, 0.0 }
 0x13e   : > { %470 = vadd.xlane.f32.xlu1 %v469_v5 }
 0x1a3   : > { %v462_v6 = vpop.xlane.xlu2 %461 }
 0x1a4   : > { %v472_v7 = vmul.f32 %v462_v6, %v447_v49 }
 0x1a6   : > { %v476_v8 = vadd.f32 1e-05, %v472_v7 }
 0x1a8   : > { %819 = vrsqrt.f32 %v476_v8  ;;  %vm486_vm5 = vweird.f32 %v476_v8 }
 0x1a9   : > { %v468_v9 = vpop.xlane.xlu0 %467 }
 0x1aa   : > { %v474_v10 = vmul.f32 %v468_v9, %v447_v49 }
 0x1ab   : > { %v465_v11 = vpop.xlane.xlu2 %464 }
 0x1ac   : > { %v478_v12 = vadd.f32 1e-05, %v474_v10  ;;  %v473_v13 = vmul.f32 %v465_v11, %v447_v49 }
 0x1ae   : > { %v820_v14 = vpop.eup %819  ;;  %821 = vrsqrt.f32 %v478_v12  ;;  %v477_v15 = vadd.f32 1e-05, %v473_v13  ;;  %vm506_vm8 = vweird.f32 %v478_v12 }
 0x1af   : > { %v481_v16 = vmul.f32 %v820_v14, %v476_v8  ;;  %vm487_vm4 = vweird.f32 %v820_v14 }
 0x1b0   : > { %823 = vrsqrt.f32 %v477_v15  ;;  %vm488_vm6 = vmor %vm486_vm5, %vm487_vm4  ;;  %vm496_vm11 = vweird.f32 %v477_v15 }
 0x1b1   : > { %v482_v17 = vmul.f32 %v820_v14, %v481_v16  ;;  %v471_v18 = vpop.xlane.xlu1 %470 }
 0x1b2   : > { %v475_v19 = vmul.f32 %v471_v18, %v447_v49 }
 0x1b3   : > { %v483_v20 = vmul.f32 0.5, %v482_v17 }
 0x1b4   : > { %v822_v21 = vpop.eup %821  ;;  %v479_v22 = vadd.f32 1e-05, %v475_v19 }
 0x1b5   : > { %v484_v23 = vsub.f32 1.5, %v483_v20  ;;  %v501_v24 = vmul.f32 %v822_v21, %v478_v12  ;;  %vm507_vm7 = vweird.f32 %v822_v21 }
 0x1b6   : > { %v824_v25 = vpop.eup %823  ;;  %825 = vrsqrt.f32 %v479_v22  ;;  %vm508_vm10 = vmor %vm506_vm8, %vm507_vm7  ;;  %vm516_vm14 = vweird.f32 %v479_v22 }
 0x1b7   : > { %v485_v26 = vmul.f32 %v820_v14, %v484_v23  ;;  %v502_v27 = vmul.f32 %v822_v21, %v501_v24  ;;  %v491_v28 = vmul.f32 %v824_v25, %v477_v15  ;;  %vm497_vm9 = vweird.f32 %v824_v25 }
 0x1b8   : > { %vm498_vm12 = vmor %vm496_vm11, %vm497_vm9 }
 0x1b9   : > { %v489_v30 = vsel %vm488_vm6, %v820_v14, %v485_v26  ;;  %v503_v31 = vmul.f32 0.5, %v502_v27  ;;  %v492_v32 = vmul.f32 %v824_v25, %v491_v28 }
 0x1ba   : > { %v520_v34 = vmul.f32 %v489_v30, %v452_v52 }
 0x1bb   : > { %v504_v35 = vsub.f32 1.5, %v503_v31  ;;  %v493_v36 = vmul.f32 0.5, %v492_v32 }
 0x1bc   : > { %v826_v37 = vpop.eup %825  ;;  %v528_v38 = vmul.f32 %v815_v29, %v520_v34 }
 0x1bd   : > { %v505_v39 = vmul.f32 %v822_v21, %v504_v35  ;;  %v494_v40 = vsub.f32 1.5, %v493_v36  ;;  %v511_v41 = vmul.f32 %v826_v37, %v479_v22  ;;  %vm517_vm13 = vweird.f32 %v826_v37 }
 0x1be   : > { %v536_v42 = vadd.f32 %v816_v33, %v528_v38  ;;  %vm518_vm15 = vmor %vm516_vm14, %vm517_vm13 }
 0x1bf   : > { %v509_v43 = vsel %vm508_vm10, %v822_v21, %v505_v39  ;;  %v495_v44 = vmul.f32 %v824_v25, %v494_v40  ;;  %v512_v45 = vmul.f32 %v826_v37, %v511_v41 }
 0x1c0   : > { %540 = vst.msk [vmem:[%s231_s14] sm:$0xff] %vm428_vm2, %v536_v42  ;;  %v522_v46 = vmul.f32 %v509_v43, %v1044_v58 }
 0x1c1   : > { %v499_v47 = vsel %vm498_vm12, %v824_v25, %v495_v44  ;;  %v513_v48 = vmul.f32 0.5, %v512_v45 }
 0x1c2   : > { %v530_v49 = vmul.f32 %v815_v29, %v522_v46  ;;  %v521_v50 = vmul.f32 %v499_v47, %v1046_v60 }
 0x1c3   : > { %v514_v51 = vsub.f32 1.5, %v513_v48 }
 0x1c4   : > { %v538_v52 = vadd.f32 %v816_v33, %v530_v49  ;;  %v529_v53 = vmul.f32 %v815_v29, %v521_v50 }
 0x1c5   : > { %v515_v54 = vmul.f32 %v826_v37, %v514_v51 }
 0x1c6   : > { %542 = vst.msk [vmem:[%s231_s14 + $0x10] sm:$0xff] %vm428_vm2, %v538_v52  ;;  %v537_v55 = vadd.f32 %v816_v33, %v529_v53 }
 0x1c7   : > { %v519_v56 = vsel %vm518_vm15, %v826_v37, %v515_v54 }
 0x1c8   : > { %541 = vst.msk [vmem:[%s231_s14 + $0x8] sm:$0xff] %vm428_vm2, %v537_v55  ;;  %v523_v57 = vmul.f32 %v519_v56, %v1054_v3 }
 0x1ca   : > { %v531_v58 = vmul.f32 %v815_v29, %v523_v57 }
 0x1cc   : > { %v539_v59 = vadd.f32 %v816_v33, %v531_v58 }
 0x1ce   : > { %543 = vst.msk [vmem:[%s231_s14 + $0x18] sm:$0xff] %vm428_vm2, %v539_v59 }
 0x1cf   : > { %854 = shalt.err (!%p851_p5)
}
 0x1d0   : > { %s908_s8 = smov 128   ;;  %s909_s14 = smov 8  }
 0x1d1   : > { %756 = dma.vmem_to_hbm [thread:$0]  (%p980_p4), %s560_s21, 512, %s562_s25, %s545_s27, %s908_s8, %s908_s8, %s909_s14  }
 0x1d2 PF: > { %p762_p6 = scmp.ge.s32.totalorder %s905_s23, 2  ;;  %s576_s15 = sand.u32 1, %s885_s18  }
 0x1d3   : > { %s577_s16 = scalar_lea.sflag [#allocation3], %s576_s15 }
 0x1d4   : > { %p759_p7 = pnand %p762_p6, %p987_p8 }
 0x1d6   : > { %p760_p9 = pneg %p759_p7 }
 0x1d8   : > { %880 = dma.done.wait (%p760_p9), %s577_s16, 512  }
 0x1d9   : > { %882 = vsyncadd (%p760_p9), %s577_s16, 4294966784  ;;  %s18_s23 = sadd.s32 1, %s905_s23   ;;  %s1121_s18 = smov %s889_s19 }
 0x1da   : > { %p15_p10 = scmp.ge.s32.totalorder %s18_s23, 4   ;;  %s1122_s19 = smov %s893_s20 }
 0x1db   : > { %s1123_s20 = smov %s993_s6  ;;  %s1124_s21 = smov %s901_s22 }
 0x1dc   : > { %s1125_s22 = smov %s1127_s26  ;;  %17 = sbr.rel (!%p15_p10) target bundleno = 4 (0x4), region = 78 }
 0x1e1   :  { %583 = vsyncpa [#allocation3], 1 }
 0x1e2   :  { %585 = vsyncpa [#allocation3 + $0x1], 1 }

</bundles_post_ra>
